<compile_context>
chip_gen: v7x
topology: tpu7x:2x2x1
jax: 0.10.0
libtpu: 0.0.40
codegen_flags: <defaults>
</compile_context>

<pallas_src>
import functools

import jax
import jax.numpy as jnp
from jax.experimental import pallas as pl
from jax.experimental.pallas import tpu as pltpu

CONTEXT_SIZE = 6
N_EMBD = 64
HEAD_SIZE = 16          # head_size constructor arg of the module (N_EMBD // 4)


def attention_head_kernel(x_ref, wqkv_ref, o_ref, *, batch, seq, head_size,
                          is_decoder):
    """Single invocation: whole (B*T, C) activation + fused QKV weight in VMEM."""
    x = x_ref[...].astype(jnp.bfloat16)            # (B*T, C)   bf16 MXU operand
    wqkv = wqkv_ref[...]                           # (C, 3*hs)  bf16, scale folded into Wq

    # One lane-dense projection for q, k and v of every batch row at once.
    qkv = jnp.dot(x, wqkv, preferred_element_type=jnp.float32)   # (B*T, 3*hs) f32

    # In-register causal mask (replaces the tril buffer input). Hoisted out of
    # the batch loop.
    if is_decoder:
        row = jax.lax.broadcasted_iota(jnp.int32, (seq, seq), 0)
        col = jax.lax.broadcasted_iota(jnp.int32, (seq, seq), 1)
        keep = row >= col                          # (T, T) bool, lower-triangular

    neg_big = jnp.float32(-1e30)                   # finite "-inf": exp() underflows to 0

    # Tiny (T, T) attention math per batch element; static unroll (batch = 2).
    for b in range(batch):
        lo, hi = b * seq, (b + 1) * seq
        q = qkv[lo:hi, 0:head_size]                # (T, hs)  already scaled by C**-0.5
        k = qkv[lo:hi, head_size:2 * head_size]    # (T, hs)
        v = qkv[lo:hi, 2 * head_size:3 * head_size]

        s = jnp.dot(q, k.T, preferred_element_type=jnp.float32)   # (T, T)
        if is_decoder:
            s = jnp.where(keep, s, neg_big)

        # numerically-stable softmax; reciprocal runs on the EUP slot
        s = s - jnp.max(s, axis=-1, keepdims=True)
        p = jnp.exp(s)
        p = p * pl.reciprocal(jnp.sum(p, axis=-1, keepdims=True), approx=True)

        out_b = jnp.dot(p, v, preferred_element_type=jnp.float32)  # (T, hs)
        o_ref[lo:hi, :] = out_b.astype(o_ref.dtype)


def attention_head(x, wq, wk, wv, *, is_decoder=True):
    """x: (B, T, C); wq/wk/wv: (C, head_size) = torch nn.Linear.weight.T."""
    B, T, C = x.shape
    hs = wq.shape[-1]

    # One-time host-side parameter prep:
    #   * fold the reference's C**-0.5 score scale into Wq,
    #   * fuse [Wq | Wk | Wv] into one (C, 3*hs) lane-dense weight,
    #   * cast to bf16 for the MXU (accumulation stays f32 in-kernel).
    scale = C ** (-0.5)                     # reference scales by C (=N_EMBD), not head_size
    wqkv = jnp.concatenate([wq * scale, wk, wv], axis=-1).astype(jnp.bfloat16)

    # Collapse the batch grid: one kernel step over the flattened (B*T, C) slab.
    x2d = x.reshape(B * T, C)

    kernel = functools.partial(attention_head_kernel, batch=B, seq=T,
                               head_size=hs, is_decoder=is_decoder)

    out2d = pl.pallas_call(
        kernel,
        out_shape=jax.ShapeDtypeStruct((B * T, hs), x.dtype),
        grid_spec=pltpu.PrefetchScalarGridSpec(
            num_scalar_prefetch=0,
            grid=(1,),                                        # single fused step
            in_specs=[
                pl.BlockSpec((B * T, C), lambda i: (0, 0)),       # x (flattened)
                pl.BlockSpec((C, 3 * hs), lambda i: (0, 0)),      # fused W_qkv
            ],
            out_specs=pl.BlockSpec((B * T, hs), lambda i: (0, 0)),
        ),
        compiler_params=pltpu.CompilerParams(
            dimension_semantics=("arbitrary",)),
    )(x2d, wqkv)

    return out2d.reshape(B, T, hs)


if __name__ == "__main__":
    key = jax.random.PRNGKey(0)
    kx, kq, kk, kv = jax.random.split(key, 4)

    B, T, C = 2, CONTEXT_SIZE, N_EMBD

    # Deterministic parameter init (shapes match nn.Linear(N_EMBD, head_size,
    # bias=False).weight.T; not a checkpoint load).
    bound = 1.0 / (N_EMBD ** 0.5)
    wq = jax.random.uniform(kq, (C, HEAD_SIZE), jnp.float32, -bound, bound)
    wk = jax.random.uniform(kk, (C, HEAD_SIZE), jnp.float32, -bound, bound)
    wv = jax.random.uniform(kv, (C, HEAD_SIZE), jnp.float32, -bound, bound)

    x = jax.random.normal(kx, (B, T, C), jnp.float32)

    out = attention_head(x, wq, wk, wv, is_decoder=True)
    out = jax.block_until_ready(out)
    assert out.shape == (B, T, HEAD_SIZE) and out.dtype == jnp.float32
    assert bool(jnp.all(jnp.isfinite(out)))
    print("KERNEL_OK")
</pallas_src>

<mosaic_0001>
module attributes {stable_mosaic.version = 11 : i64} {
  func.func @attention_head_kernel(%arg0: i32, %arg1: memref<12x64xf32, #tpu.memory_space<vmem>>, %arg2: memref<64x48xbf16, #tpu.memory_space<vmem>>, %arg3: memref<12x16xf32, #tpu.memory_space<vmem>>) attributes {dimension_semantics = [#tpu.dimension_semantics<arbitrary>], iteration_bounds = array<i64: 1>, scalar_prefetch = 0 : i64, scratch_operands = 0 : i64, tpu.core_type = #tpu.core_type<tc>, window_params = [{pipeline_mode = #tpu.pipeline_mode<synchronous>, transform_indices = @transform_0, window_bounds = array<i64: 12, 64>}, {pipeline_mode = #tpu.pipeline_mode<synchronous>, transform_indices = @transform_1, window_bounds = array<i64: 64, 48>}, {pipeline_mode = #tpu.pipeline_mode<synchronous>, transform_indices = @transform_2, window_bounds = array<i64: 12, 16>}]} {
    %c0 = arith.constant 0 : index
    %c0_0 = arith.constant 0 : index
    %0 = vector.load %arg1[%c0, %c0_0] : memref<12x64xf32, #tpu.memory_space<vmem>>, vector<12x64xf32>
    %1 = arith.truncf %0 : vector<12x64xf32> to vector<12x64xbf16>
    %c0_1 = arith.constant 0 : index
    %c0_2 = arith.constant 0 : index
    %2 = vector.load %arg2[%c0_1, %c0_2] : memref<64x48xbf16, #tpu.memory_space<vmem>>, vector<64x48xbf16>
    %cst = arith.constant dense<0.000000e+00> : vector<12x48xf32>
    %3 = tpu.matmul %1, %2, %cst {dimension_numbers = #tpu.dot_dimension_numbers<[1], [0], [0], [1], [0, 0, 1, 1], [], []>} : vector<12x64xbf16>, vector<64x48xbf16>, vector<12x48xf32> -> vector<12x48xf32>
    %4 = tpu.iota {dimensions = array<i32: 0>} : vector<6x6xi32>
    %5 = tpu.iota {dimensions = array<i32: 1>} : vector<6x6xi32>
    %6 = arith.cmpi sge, %4, %5 : vector<6x6xi32>
    %7 = vector.extract_strided_slice %3 {offsets = [0, 0], sizes = [6, 16], strides = [1, 1]} : vector<12x48xf32> to vector<6x16xf32>
    %8 = vector.extract_strided_slice %3 {offsets = [0, 16], sizes = [6, 16], strides = [1, 1]} : vector<12x48xf32> to vector<6x16xf32>
    %9 = vector.extract_strided_slice %3 {offsets = [0, 32], sizes = [6, 16], strides = [1, 1]} : vector<12x48xf32> to vector<6x16xf32>
    %10 = tpu.transpose %8, [1, 0] : vector<6x16xf32> -> vector<16x6xf32>
    %cst_3 = arith.constant dense<0.000000e+00> : vector<6x6xf32>
    %11 = tpu.matmul %7, %10, %cst_3 {dimension_numbers = #tpu.dot_dimension_numbers<[1], [0], [0], [1], [0, 0, 1, 1], [], []>} : vector<6x16xf32>, vector<16x6xf32>, vector<6x6xf32> -> vector<6x6xf32>
    %cst_4 = arith.constant -1.000000e+30 : f32
    %12 = vector.broadcast %cst_4 : f32 to vector<6x6xf32>
    %13 = arith.select %6, %11, %12 : vector<6x6xi1>, vector<6x6xf32>
    %cst_5 = arith.constant dense<0xFF800000> : vector<6xf32>
    %14 = vector.multi_reduction <maximumf>, %13, %cst_5 [1] : vector<6x6xf32> to vector<6xf32>
    %15 = vector.shape_cast %14 : vector<6xf32> to vector<6x1xf32>
    %16 = vector.broadcast %15 : vector<6x1xf32> to vector<6x6xf32>
    %17 = arith.subf %13, %16 : vector<6x6xf32>
    %18 = math.exp %17 : vector<6x6xf32>
    %cst_6 = arith.constant dense<0.000000e+00> : vector<6xf32>
    %19 = vector.multi_reduction <add>, %18, %cst_6 [1] : vector<6x6xf32> to vector<6xf32>
    %20 = vector.shape_cast %19 : vector<6xf32> to vector<6x1xf32>
    %21 = tpu.reciprocal %20 {approx = true} : vector<6x1xf32> -> vector<6x1xf32>
    %22 = vector.broadcast %21 : vector<6x1xf32> to vector<6x6xf32>
    %23 = arith.mulf %18, %22 : vector<6x6xf32>
    %cst_7 = arith.constant dense<0.000000e+00> : vector<6x16xf32>
    %24 = tpu.matmul %23, %9, %cst_7 {dimension_numbers = #tpu.dot_dimension_numbers<[1], [0], [0], [1], [0, 0, 1, 1], [], []>} : vector<6x6xf32>, vector<6x16xf32>, vector<6x16xf32> -> vector<6x16xf32>
    %c0_8 = arith.constant 0 : index
    %c0_9 = arith.constant 0 : index
    %25 = vector.load %arg3[%c0_8, %c0_9] : memref<12x16xf32, #tpu.memory_space<vmem>>, vector<6x16xf32>
    tpu.vector_store %arg3[%c0_8, %c0_9], %24 {strides = array<i32>} : memref<12x16xf32, #tpu.memory_space<vmem>>, vector<6x16xf32>,
    %26 = vector.extract_strided_slice %3 {offsets = [6, 0], sizes = [6, 16], strides = [1, 1]} : vector<12x48xf32> to vector<6x16xf32>
    %27 = vector.extract_strided_slice %3 {offsets = [6, 16], sizes = [6, 16], strides = [1, 1]} : vector<12x48xf32> to vector<6x16xf32>
    %28 = vector.extract_strided_slice %3 {offsets = [6, 32], sizes = [6, 16], strides = [1, 1]} : vector<12x48xf32> to vector<6x16xf32>
    %29 = tpu.transpose %27, [1, 0] : vector<6x16xf32> -> vector<16x6xf32>
    %cst_10 = arith.constant dense<0.000000e+00> : vector<6x6xf32>
    %30 = tpu.matmul %26, %29, %cst_10 {dimension_numbers = #tpu.dot_dimension_numbers<[1], [0], [0], [1], [0, 0, 1, 1], [], []>} : vector<6x16xf32>, vector<16x6xf32>, vector<6x6xf32> -> vector<6x6xf32>
    %cst_11 = arith.constant -1.000000e+30 : f32
    %31 = vector.broadcast %cst_11 : f32 to vector<6x6xf32>
    %32 = arith.select %6, %30, %31 : vector<6x6xi1>, vector<6x6xf32>
    %cst_12 = arith.constant dense<0xFF800000> : vector<6xf32>
    %33 = vector.multi_reduction <maximumf>, %32, %cst_12 [1] : vector<6x6xf32> to vector<6xf32>
    %34 = vector.shape_cast %33 : vector<6xf32> to vector<6x1xf32>
    %35 = vector.broadcast %34 : vector<6x1xf32> to vector<6x6xf32>
    %36 = arith.subf %32, %35 : vector<6x6xf32>
    %37 = math.exp %36 : vector<6x6xf32>
    %cst_13 = arith.constant dense<0.000000e+00> : vector<6xf32>
    %38 = vector.multi_reduction <add>, %37, %cst_13 [1] : vector<6x6xf32> to vector<6xf32>
    %39 = vector.shape_cast %38 : vector<6xf32> to vector<6x1xf32>
    %40 = tpu.reciprocal %39 {approx = true} : vector<6x1xf32> -> vector<6x1xf32>
    %41 = vector.broadcast %40 : vector<6x1xf32> to vector<6x6xf32>
    %42 = arith.mulf %37, %41 : vector<6x6xf32>
    %cst_14 = arith.constant dense<0.000000e+00> : vector<6x16xf32>
    %43 = tpu.matmul %42, %28, %cst_14 {dimension_numbers = #tpu.dot_dimension_numbers<[1], [0], [0], [1], [0, 0, 1, 1], [], []>} : vector<6x6xf32>, vector<6x16xf32>, vector<6x16xf32> -> vector<6x16xf32>
    %c6 = arith.constant 6 : index
    %c0_15 = arith.constant 0 : index
    %44 = vector.load %arg3[%c6, %c0_15] : memref<12x16xf32, #tpu.memory_space<vmem>>, vector<6x16xf32>
    tpu.vector_store %arg3[%c6, %c0_15], %43 {strides = array<i32>} : memref<12x16xf32, #tpu.memory_space<vmem>>, vector<6x16xf32>,
    return
  }
  func.func @transform_0(%arg0: i32) -> (i32, i32) {
    %c0_i32 = arith.constant 0 : i32
    %c0_i32_0 = arith.constant 0 : i32
    %c0_i32_1 = arith.constant 0 : i32
    return %c0_i32, %c0_i32_0 : i32, i32
  }
  func.func @transform_1(%arg0: i32) -> (i32, i32) {
    %c0_i32 = arith.constant 0 : i32
    %c0_i32_0 = arith.constant 0 : i32
    %c0_i32_1 = arith.constant 0 : i32
    return %c0_i32, %c0_i32_0 : i32, i32
  }
  func.func @transform_2(%arg0: i32) -> (i32, i32) {
    %c0_i32 = arith.constant 0 : i32
    %c0_i32_0 = arith.constant 0 : i32
    %c0_i32_1 = arith.constant 0 : i32
    return %c0_i32, %c0_i32_0 : i32, i32
  }
}

</mosaic_0001>

<bundles_post_ra>
// kernel: tpu_custom_call.1
= control target key start
LH: loop header
LB: loop body
LE: loop exit
PB: predicated region body
PF: predicated region fallthrough
CT: control target
= control target key end

     0   :  { %v558_v1 = vmov 0.0   ;;  %vm559_vm0 = vmmov 0   ;;  %s648_s0 = inlined_call_operand.vmem [shape: f32[12,64], index: 0, kind: input, shape index: {}]   ;;  %s649_s1 = inlined_call_operand.vmem [shape: bf16[64,48], index: 1, kind: input, shape index: {}]   ;;  %s650_s2 = inlined_call_operand.hbm [shape: f32[12,16], index: 2, kind: output, shape index: {}]  }
   0x1   :  { %v522_v0 = vld [vmem:[%s649_s1] sm:$0xff]   ;;  %483 = vmatprep.subr.bf16.mxu0 %v558_v1  ;;  %495 = vmatprep.subr.mxu1 %v558_v1  ;;  %v523_v2 = vld [vmem:[%s649_s1 + $0x8] sm:$0xff]  }
   0x2   :  { %484 = vmatpush3.bf16.msra.mxu0 %v522_v0  ;;  %491 = vmatprep.mubr.msk.bf16.mxu0 %vm559_vm0, %v558_v1 }
   0x3   :  { %485 = vmatprep.subr.bf16.mxu0 %v558_v1  ;;  %497 = vmatprep.mubr.msk.f32.mxu1 %vm559_vm0, %v558_v1 }
   0x4   :  { %7 = vsyncpa [#allocation3], 0  ;;  %v524_v3 = vld [vmem:[%s649_s1 + $0x10] sm:$0xff]   ;;  %v525_v4 = vld [vmem:[%s649_s1 + $0x18] sm:$0xff]   ;;  %vm48_vm1 = vcmask 523264   ;;  %s560_s21 = smov 96   ;;  %v93_v17 = vlaneseq }
   0x5   :  { %v13_v5 = vld [vmem:[%s648_s0] sm:$0xff]  ;;  %v14_v6 = vld [vmem:[%s648_s0 + $0x8] sm:$0xf]  ;;  %s561_s22 = smov 112   ;;  %vm271_vm2 = vcmask 1041408   ;;  %vm101_vm3 = vcmask 130048  }
   0x6   :  { %486 = vmatpush3.bf16.msra.mxu0 %v523_v2  ;;  %v15_v7 = vpack.c.bf16 %v14_v6, %v13_v5  ;;  %vm195_vm4 = vcmask 1045504   ;;  %v94_v18 = vshrl.u32 %v93_v17, 7  ;;  %v96_v19 = vand.u32 127, %v93_v17  ;;  %s562_s0 = smov [#allocation2]  }
   0x7   :  { %487 = vmatprep.subr.bf16.mxu0 %v558_v1  ;;  %vm177_vm6 = vcmask 46080   ;;  %vm191_vm7 = vcmask 48128   ;;  %vm268_vm8 = vcmask 128000   ;;  %s446_s1 = sshll.u32 %s562_s0, 4  ;;  %s447_s1 = int_to_ptr.vmem [resolvable:$true] %s446_s1 }
   0x8   :  { %vm97_vm5 = vcmp.ge.s32.totalorder %v94_v18, %v96_v19  ;;  %s534_s23 = scalar_lea.vmem %s447_s1, 256  ;;  %p539_p1 = scmp.lt.s32.totalorder %s447_s1, %s447_s1 }
   0x9   :  { %p535_p0 = scmp.ne.s32.totalorder %s447_s1, %s534_s23  ;;  %p540_p2 = scmp.lt.s32.totalorder %s534_s23, %s534_s23 }
   0xa   :  { %488 = vmatpush3.bf16.msra.mxu0 %v524_v3 }
   0xb   :  { %489 = vmatprep.subr.bf16.mxu0 %v558_v1  ;;  %p541_p3 = por %p540_p2, %p539_p1 }
   0xd   :  { %p542_p4 = pnand %p541_p3, %p535_p0 }
   0xe   :  { %490 = vmatpush3.bf16.msra.mxu0 %v525_v4 }
  0x11   :  { %492 = vmatmul.mubr.msk.bf16.vlgmr.msra.gmra.mrb[0].mxu0 %vm48_vm1, %v15_v7 }
  0xe4   :  { %v86_v8 = vpop.f32.mrb[0].mxu0 }
  0xe5   :  { %189 = vrot.lane.b32.xlu1 %v86_v8, %s560_s21  ;;  %99 = vrot.lane.b32.xlu0 %v86_v8, %s561_s22  ;;  %v493_v9 = vpop.f32.mrb[1].mxu0  ;;  %v272_v11 = vrot.slane %v86_v8, 6 }
  0xe6   :  { %v89_v10 = vpop.f32.mrb[2].mxu0 }
  0xe7   :  { %v273_v12 = vrot.slane %v89_v10, 6  ;;  %v494_v13 = vpop.f32.mrb[3].mxu0 }
  0xe9   :  { %v274_v14 = vsel %vm271_vm2, %v272_v11, %v273_v12 }
 0x157   :  { %v100_v15 = vpop.permute.xlu0 %99  ;;  %v190_v16 = vpop.permute.xlu1 %189 }
 0x158   :  { %496 = vmatpush3.xpose.msk.msra.mxu1 %vm101_vm3, %v100_v15 }
 0x159   :  { %500 = vmatprep.subr.mxu1 %v558_v1 }
 0x15b   :  { %498 = vmatmul.mubr.msk.f32.vlgmr.msra.gmra.mrb[0].mxu1 %vm101_vm3, %v86_v8 }
 0x15c   :  { %501 = vmatpush3.msk.msra.mxu1 %vm195_vm4, %v190_v16  ;;  %502 = vmatprep.mubr.msk.f32.mxu1 %vm559_vm0, %v558_v1 }
 0x15d   :  { %505 = vmatprep.subr.mxu1 %v558_v1 }
 0x22e   :  { %v172_v20 = vpop.f32.mrb[0].mxu1 }
 0x22f   :  { %v176_v21 = vsel %vm97_vm5, %v172_v20, -1e+30  ;;  %v499_v22 = vpop.f32.mrb[1].mxu1 }
 0x230   :  { %v178_v23 = vsel %vm177_vm6, %v176_v21, -inf }
 0x231   :  { %179 = vmax.xlane.f32.xlu0 %v178_v23 }
 0x2be   :  { %v180_v24 = vpop.xlane.xlu0 %179 }
 0x2bf   :  { %v181_v25 = vsub.f32 %v176_v21, %v180_v24 }
 0x2c1   :  { %v182_v26 = vmul.f32 1.442695, %v181_v25 }
 0x2c3   :  { %526 = vpow2.f32 %v182_v26 }
 0x2cd   :  { %v527_v27 = vpop.eup %526 }
 0x2ce   :  { %v184_v28 = vsel %vm177_vm6, %v527_v27, 0.0 }
 0x2cf   :  { %185 = vadd.xlane.f32.xlu1 %v184_v28 }
 0x2e0   :  { %275 = vrot.lane.b32.xlu1 %v274_v14, %s561_s22 }
 0x35c   :  { %v186_v29 = vpop.xlane.xlu1 %185 }
 0x35d   :  { %528 = vrcp.f32 %v186_v29 }
 0x360   :  { %v276_v32 = vpop.permute.xlu1 %275 }
 0x367   :  { %v529_v30 = vpop.eup %528 }
 0x368   :  { %v188_v31 = vmul.f32 %v529_v30, %v527_v27 }
 0x36a   :  { %503 = vmatmul.mubr.msk.f32.vlgmr.msra.gmra.mrb[2].mxu1 %vm191_vm7, %v188_v31 }
 0x36b   :  { %506 = vmatpush3.xpose.msk.msra.mxu1 %vm101_vm3, %v276_v32  ;;  %507 = vmatprep.mubr.msk.f32.mxu1 %vm559_vm0, %v558_v1 }
 0x36c   :  { %510 = vmatprep.subr.mxu1 %v558_v1 }
 0x36e   :  { %508 = vmatmul.mubr.msk.f32.vlgmr.msra.gmra.mrb[4].mxu1 %vm101_vm3, %v274_v14 }
 0x36f   :  { %512 = vmatprep.mubr.msk.f32.mxu1 %vm559_vm0, %v558_v1 }
 0x43d   :  { %v264_v33 = vpop.f32.mrb[2].mxu1 }
 0x43e   :  { %269 = vst.msk [vmem:[#allocation2] sm:$0x3f] %vm268_vm8, %v264_v33  ;;  %v504_v34 = vpop.f32.mrb[3].mxu1 }
 0x441   :  { %v347_v35 = vpop.f32.mrb[4].mxu1 }
 0x442   :  { %v351_v36 = vsel %vm97_vm5, %v347_v35, -1e+30  ;;  %v509_v37 = vpop.f32.mrb[5].mxu1 }
 0x443   :  { %v352_v38 = vsel %vm177_vm6, %v351_v36, -inf }
 0x444   :  { %353 = vmax.xlane.f32.xlu1 %v352_v38 }
 0x4d1   :  { %v354_v39 = vpop.xlane.xlu1 %353 }
 0x4d2   :  { %v355_v40 = vsub.f32 %v351_v36, %v354_v39 }
 0x4d4   :  { %v356_v41 = vmul.f32 1.442695, %v355_v40 }
 0x4d6   :  { %530 = vpow2.f32 %v356_v41 }
 0x4e0   :  { %v531_v42 = vpop.eup %530 }
 0x4e1   :  { %v358_v43 = vsel %vm177_vm6, %v531_v42, 0.0 }
 0x4e2   :  { %359 = vadd.xlane.f32.xlu0 %v358_v43 }
 0x4f8   :  { %363 = vrot.lane.b32.xlu0 %v274_v14, %s560_s21 }
 0x56f   :  { %v360_v44 = vpop.xlane.xlu0 %359 }
 0x570   :  { %532 = vrcp.f32 %v360_v44 }
 0x573   :  { %v364_v45 = vpop.permute.xlu0 %363 }
 0x574   :  { %511 = vmatpush3.msk.msra.mxu1 %vm195_vm4, %v364_v45 }
 0x57a   :  { %v533_v46 = vpop.eup %532 }
 0x57b   :  { %v362_v47 = vmul.f32 %v533_v46, %v531_v42 }
 0x57d   :  { %513 = vmatmul.mubr.msk.f32.vlgmr.msra.gmra.mrb[6].mxu1 %vm191_vm7, %v362_v47 }
 0x650   :  { %v436_v48 = vpop.f32.mrb[6].mxu1 }
 0x651   :  { %440 = vst.msk [vmem:[#allocation2 + $0x6] sm:$0x3f] %vm268_vm8, %v436_v48  ;;  %v514_v49 = vpop.f32.mrb[7].mxu1 }
 0x652   :  { %545 = shalt.err (!%p542_p4)
}
 0x653   :  { %s546_s26 = scalar_lea.hbm %s650_s2, 256 }
 0x654   :  { %p547_p5 = scmp.ne.s32.totalorder %s650_s2, %s546_s26  ;;  %p550_p6 = scmp.lt.u32.totalorder %s546_s26, %s650_s2 }
 0x656   :  { %p552_p7 = pnand %p550_p6, %p547_p5 }
 0x658   :  { %555 = shalt.err (!%p552_p7)
}
 0x659   :  { %s563_s3 = smov 128   ;;  %s564_s4 = smov 8  }
 0x65a   :  { %452 = dma.vmem_to_hbm [thread:$0]  %s447_s1, 256, %s650_s2, [#allocation3], %s563_s3, %s563_s3, %s564_s4  }
 0x65b   :  { %556 = dma.done.wait [#allocation3], 256  }
 0x65c   :  { %557 = vsyncadd [#allocation3], 4294967040 }
 0x65d   :  { %456 = vsyncpa [#allocation3], 1 }

</bundles_post_ra>
